<compile_context>
chip_gen: v6e
topology: v6e:2x2x1
jax: 0.10.0
libtpu: 0.0.40
codegen_flags: <defaults>
</compile_context>

<pallas_src>
import math

import jax
import jax.numpy as jnp
from jax.experimental import pallas as pl
from jax.experimental.pallas import tpu as pltpu


def _pe3d_kernel(xslab_ref, yzslab_ref, o_ref):
    # xslab_ref : (tx, L)  output-dtype  x-dependent channel part
    # yzslab_ref: (ty, L)  output-dtype  y+z dependent channel part
    # o_ref     : (1, tx, ty, L) output dtype
    # Exactly one of the two parts is nonzero for each channel slot, so the
    # dtype-native add against an exact 0.0 reproduces PyTorch's per-slice
    # cast-and-assign bit-exactly.  No f32 intermediate, no cast, one store.
    o_ref[0] = xslab_ref[...][:, None, :] + yzslab_ref[...][None, :, :]


def _round_up(n, m):
    return ((n + m - 1) // m) * m


def _tile_candidates(extent, align):
    """Tile sizes legal under the (sublane, lane) block constraint: multiples
    of the dtype's sublane alignment that divide the extent, or the full
    extent itself."""
    cands = {extent}
    cands.update(t for t in range(align, extent + 1, align) if extent % t == 0)
    return sorted(cands)


def _vmem_need(tx, ty, L, itemsize, align):
    """Kernel VMEM with padding: double-buffered output block + double-buffered
    slab blocks (the add produces its result straight into the output buffer,
    so there is no separate full-size temp)."""
    Lp = _round_up(L, 128)
    out = 2 * tx * _round_up(ty, align) * Lp * itemsize
    xs = 2 * _round_up(tx, align) * Lp * itemsize
    yz = 2 * _round_up(ty, align) * Lp * itemsize
    return out + xs + yz


def _pick_tiles(B, X, Y, L, itemsize, *, budget_bytes=32 << 20, min_steps=4):
    """Largest (tx, ty) whose padded VMEM footprint fits the budget while the
    grid keeps at least `min_steps` steps (when achievable) so both v7x
    TensorCores get work even for B == 1."""
    align = max(8, 32 // itemsize)
    tx_cands = _tile_candidates(X, align)
    ty_cands = _tile_candidates(Y, align)

    fitting = [(tx, ty) for ty in ty_cands for tx in tx_cands
               if _vmem_need(tx, ty, L, itemsize, align) <= budget_bytes]
    if not fitting:
        # Even the smallest legal blocks exceed the budget; take them anyway
        # (the wrapper raises vmem_limit_bytes to match).
        return min(tx_cands), min(ty_cands)

    max_steps = B * (X // min(tx_cands)) * (Y // min(ty_cands))
    eff_min = min(min_steps, max_steps)
    good = [(tx, ty) for (tx, ty) in fitting
            if B * (X // tx) * (Y // ty) >= eff_min]
    pool = good if good else fitting
    # Maximize block volume; tie-break towards full-Y blocks (contiguous HBM
    # writeback per step).
    return max(pool, key=lambda t: (t[0] * t[1], t[1]))


def positional_encoding_3d(tensor, channels, *, tx=None, ty=None):
    """tensor: (B, X, Y, Z, orig_ch); `channels` is the module's ctor arg."""
    B, X, Y, Z, orig_ch = tensor.shape
    ch = int(math.ceil(channels / 6) * 2)
    if ch % 2:
        ch += 1
    Cc = min(orig_ch, 3 * ch)          # PyTorch slices emb[..., :orig_ch]
    L = Z * Cc                         # lane-dense flattened (z, c) axis
    out_dtype = tensor.dtype
    itemsize = jnp.dtype(out_dtype).itemsize
    align = max(8, 32 // itemsize)

    # --- tiny tables, computed once per call outside the kernel -------------
    inv_freq = 1.0 / (10000.0 ** (jnp.arange(0, ch, 2, dtype=jnp.float32) / ch))

    def axis_emb(n):
        s = jnp.arange(n, dtype=jnp.float32)[:, None] * inv_freq[None, :]
        return jnp.concatenate([jnp.sin(s), jnp.cos(s)], axis=-1)      # (n, ch)

    def place(tab, start):
        n = tab.shape[0]
        full = jnp.zeros((n, 3 * ch), jnp.float32)
        full = full.at[:, start:start + ch].set(tab)
        return full[:, :Cc]                                            # (n, Cc)

    # Disjoint channel ranges [0,ch), [ch,2ch), [2ch,3ch): every channel slot
    # has exactly ONE nonzero contributor.  This invariant is what makes the
    # output-dtype (e.g. bf16) in-kernel add bit-exact vs PyTorch.
    x_tab = place(axis_emb(X), 0)        # (X, Cc)
    y_tab = place(axis_emb(Y), ch)       # (Y, Cc)
    z_tab = place(axis_emb(Z), 2 * ch)   # (Z, Cc)

    x_slab = jnp.tile(x_tab[:, None, :], (1, Z, 1)).reshape(X, L).astype(out_dtype)
    yz_slab = (y_tab[:, None, :] + z_tab[None, :, :]).reshape(Y, L).astype(out_dtype)

    # --- tiling + VMEM budget ------------------------------------------------
    if tx is None or ty is None:
        atx, aty = _pick_tiles(B, X, Y, L, itemsize)
        if tx is None:
            tx = atx
        if ty is None:
            ty = aty
    assert X % tx == 0 and Y % ty == 0, "tiles must divide the extents"

    need = _vmem_need(tx, ty, L, itemsize, align)
    vmem_limit = max(32 << 20, int(need) + (4 << 20))

    grid = (B, X // tx, Y // ty)
    out_bytes = B * X * Y * L * itemsize
    slab_bytes = (X + Y) * L * itemsize
    cost = pl.CostEstimate(flops=B * X * Y * L,          # one add per element
                           transcendentals=0,
                           bytes_accessed=out_bytes + slab_bytes)

    out_flat = pl.pallas_call(
        _pe3d_kernel,
        out_shape=jax.ShapeDtypeStruct((B, X, Y, L), out_dtype),
        grid_spec=pltpu.PrefetchScalarGridSpec(
            num_scalar_prefetch=0,
            grid=grid,
            in_specs=[
                pl.BlockSpec((tx, L), lambda b, i, j: (i, 0)),
                pl.BlockSpec((ty, L), lambda b, i, j: (j, 0)),
            ],
            out_specs=pl.BlockSpec((1, tx, ty, L), lambda b, i, j: (b, i, j, 0)),
        ),
        compiler_params=pltpu.CompilerParams(
            dimension_semantics=("parallel", "parallel", "parallel"),
            vmem_limit_bytes=vmem_limit),
        cost_estimate=cost,
    )(x_slab, yz_slab)

    return out_flat.reshape(B, X, Y, Z, Cc)


def reference(tensor, channels):
    """Pure-JAX reference mirroring the PyTorch forward."""
    B, X, Y, Z, orig_ch = tensor.shape
    ch = int(math.ceil(channels / 6) * 2)
    if ch % 2:
        ch += 1
    inv_freq = 1.0 / (10000.0 ** (jnp.arange(0, ch, 2, dtype=jnp.float32) / ch))
    sx = jnp.arange(X, dtype=jnp.float32)[:, None] * inv_freq
    sy = jnp.arange(Y, dtype=jnp.float32)[:, None] * inv_freq
    sz = jnp.arange(Z, dtype=jnp.float32)[:, None] * inv_freq
    emb_x = jnp.concatenate([jnp.sin(sx), jnp.cos(sx)], -1)[:, None, None, :]
    emb_y = jnp.concatenate([jnp.sin(sy), jnp.cos(sy)], -1)[None, :, None, :]
    emb_z = jnp.concatenate([jnp.sin(sz), jnp.cos(sz)], -1)[None, None, :, :]
    emb = jnp.zeros((X, Y, Z, 3 * ch), jnp.float32)
    emb = emb.at[..., :ch].set(jnp.broadcast_to(emb_x, (X, Y, Z, ch)))
    emb = emb.at[..., ch:2 * ch].set(jnp.broadcast_to(emb_y, (X, Y, Z, ch)))
    emb = emb.at[..., 2 * ch:].set(jnp.broadcast_to(emb_z, (X, Y, Z, ch)))
    emb = emb.astype(tensor.dtype)
    Cc = min(orig_ch, 3 * ch)
    return jnp.broadcast_to(emb[None, ..., :Cc], (B, X, Y, Z, Cc))


if __name__ == "__main__":
    key = jax.random.PRNGKey(0)

    # Case 1 (f32): (B, X, Y, Z, C) = (2, 16, 8, 8, 16) -> ch=6, Cc=16, L=128.
    # Tile picker chooses tx=8, ty=8 -> grid (2, 2, 1): 4 parallel steps.
    x = jax.random.normal(key, (2, 16, 8, 8, 16), dtype=jnp.float32)
    out = jax.block_until_ready(positional_encoding_3d(x, channels=16))
    ref = reference(x, 16)
    assert out.shape == ref.shape and out.dtype == x.dtype
    assert jnp.allclose(out, ref, atol=1e-6, rtol=1e-6), "f32 mismatch vs reference"

    # Case 2 (bf16, B=1): exercises the output-dtype (no-f32-temp) add path
    # and a 16-aligned bf16 tiling.  (B, X, Y, Z, C) = (1, 16, 16, 4, 32).
    xb = jax.random.normal(jax.random.PRNGKey(0), (1, 16, 16, 4, 32),
                           dtype=jnp.bfloat16)
    outb = jax.block_until_ready(positional_encoding_3d(xb, channels=32))
    refb = reference(xb, 32)
    assert outb.shape == refb.shape and outb.dtype == xb.dtype
    assert jnp.allclose(outb.astype(jnp.float32), refb.astype(jnp.float32),
                        atol=1e-2, rtol=1e-2), "bf16 mismatch vs reference"

    print("KERNEL_OK")
</pallas_src>

<mosaic_0001>
module attributes {stable_mosaic.version = 11 : i64} {
  func.func @_pe3d_kernel(%arg0: i32, %arg1: i32, %arg2: i32, %arg3: memref<8x128xf32, #tpu.memory_space<vmem>>, %arg4: memref<8x128xf32, #tpu.memory_space<vmem>>, %arg5: memref<1x8x8x128xf32, #tpu.memory_space<vmem>>) attributes {dimension_semantics = [#tpu.dimension_semantics<parallel>, #tpu.dimension_semantics<parallel>, #tpu.dimension_semantics<parallel>], iteration_bounds = array<i64: 2, 2, 1>, scalar_prefetch = 0 : i64, scratch_operands = 0 : i64, tpu.core_type = #tpu.core_type<tc>, window_params = [{transform_indices = @transform_0, window_bounds = array<i64: 8, 128>}, {transform_indices = @transform_1, window_bounds = array<i64: 8, 128>}, {transform_indices = @transform_2, window_bounds = array<i64: 1, 8, 8, 128>}]} {
    %c0 = arith.constant 0 : index
    %c0_0 = arith.constant 0 : index
    %0 = vector.load %arg3[%c0, %c0_0] : memref<8x128xf32, #tpu.memory_space<vmem>>, vector<8x128xf32>
    %1 = vector.shape_cast %0 : vector<8x128xf32> to vector<8x1x128xf32>
    %c0_1 = arith.constant 0 : index
    %c0_2 = arith.constant 0 : index
    %2 = vector.load %arg4[%c0_1, %c0_2] : memref<8x128xf32, #tpu.memory_space<vmem>>, vector<8x128xf32>
    %3 = vector.shape_cast %2 : vector<8x128xf32> to vector<1x8x128xf32>
    %4 = vector.broadcast %1 : vector<8x1x128xf32> to vector<8x8x128xf32>
    %5 = vector.broadcast %3 : vector<1x8x128xf32> to vector<8x8x128xf32>
    %6 = arith.addf %4, %5 : vector<8x8x128xf32>
    %c0_3 = arith.constant 0 : index
    %c0_4 = arith.constant 0 : index
    %c0_5 = arith.constant 0 : index
    %c0_6 = arith.constant 0 : index
    %7 = vector.load %arg5[%c0_3, %c0_4, %c0_5, %c0_6] : memref<1x8x8x128xf32, #tpu.memory_space<vmem>>, vector<1x8x8x128xf32>
    %8 = vector.shape_cast %7 : vector<1x8x8x128xf32> to vector<8x8x128xf32>
    %9 = vector.shape_cast %6 : vector<8x8x128xf32> to vector<1x8x8x128xf32>
    tpu.vector_store %arg5[%c0_3, %c0_4, %c0_5, %c0_6], %9 {strides = array<i32>} : memref<1x8x8x128xf32, #tpu.memory_space<vmem>>, vector<1x8x8x128xf32>,
    return
  }
  func.func @transform_0(%arg0: i32, %arg1: i32, %arg2: i32) -> (i32, i32) {
    %c0_i32 = arith.constant 0 : i32
    %c0_i32_0 = arith.constant 0 : i32
    return %arg1, %c0_i32 : i32, i32
  }
  func.func @transform_1(%arg0: i32, %arg1: i32, %arg2: i32) -> (i32, i32) {
    %c0_i32 = arith.constant 0 : i32
    %c0_i32_0 = arith.constant 0 : i32
    return %arg2, %c0_i32 : i32, i32
  }
  func.func @transform_2(%arg0: i32, %arg1: i32, %arg2: i32) -> (i32, i32, i32, i32) {
    %c0_i32 = arith.constant 0 : i32
    %c0_i32_0 = arith.constant 0 : i32
    return %arg0, %arg1, %arg2, %c0_i32 : i32, i32, i32, i32
  }
}

</mosaic_0001>

<bundles_post_ra>
// kernel: tpu_custom_call.1
= control target key start
LH: loop header
LB: loop body
LE: loop exit
PB: predicated region body
PF: predicated region fallthrough
CT: control target
= control target key end

     0   :  { %s986_s0 = inlined_call_operand.hbm [shape: f32[16,128], index: 0, kind: input, shape index: {}]   ;;  %s987_s1 = inlined_call_operand.hbm [shape: f32[8,128], index: 1, kind: input, shape index: {}]   ;;  %s988_s2 = inlined_call_operand.hbm [shape: f32[2,16,8,128], index: 2, kind: output, shape index: {}]  }
   0x1   :  { %994 = sst [smem:[#allocation14_spill]] %s987_s1 }
   0x2   :  { %995 = sst [smem:[#allocation15_spill]] %s988_s2 }
   0x3   :  { %7 = vsyncpa [#allocation3], 0 }
   0x4   :  { %9 = vsyncpa [#allocation3 + $0x1], 0 }
   0x5   :  { %10 = vsyncpa [#allocation6], 0 }
   0x6   :  { %11 = vsyncpa [#allocation4], 0 }
   0x7   :  { %13 = vsyncpa [#allocation4 + $0x1], 0  ;;  %s766_s9 = smov 0   ;;  %s768_s10 = smov 0  }
   0x8   :  { %s770_s11 = smov 0   ;;  %s772_s12 = smov 0  }
   0x9   :  { %s774_s13 = smov 0   ;;  %s776_s14 = smov 0  }
   0xa   :  { %s778_s15 = smov 0   ;;  %s780_s16 = smov 0  }
   0xb   :  { %s782_s17 = smov 0   ;;  %s784_s18 = smov 0  }
   0xc   :  { %s786_s19 = smov 0  }
   0xd LB: > { %996 = sst [smem:[#allocation11_spill]] %s703_s9  ;;  %s431_s20 = sadd.s32 4294967295, %s743_s19   ;;  %s743_s19 = sphi %s786_s19, %s19_s19   ;;  %s739_s18 = sphi %s784_s18, %s1022_s18   ;;  %s735_s17 = sphi %s782_s17, %s1021_s17   ;;  %s731_s16 = sphi %s780_s16, %s1020_s16   ;;  %s727_s15 = sphi %s778_s15, %s1019_s15   ;;  %s723_s14 = sphi %s776_s14, %s1018_s14   ;;  %s719_s13 = sphi %s774_s13, %s1017_s13   ;;  %s715_s12 = sphi %s772_s12, %s1016_s12   ;;  %s711_s11 = sphi %s770_s11, %s1015_s11   ;;  %s707_s10 = sphi %s768_s10, %s1014_s10   ;;  %s703_s9 = sphi %s766_s9, %s1013_s9  }
   0xe   : > { %s432_s21 = sadd.s32 4294967294, %s743_s19   ;;  %p58_p0 = scmp.ne.s32.totalorder %s719_s13, %s715_s12 }
   0xf   : > { %p822_p1 = scmp.eq.s32.totalorder %s431_s20, 0  ;;  %p111_p2 = scmp.ne.s32.totalorder %s711_s11, %s707_s10 }
  0x10   : > { %p112_p3 = scmp.eq.s32.totalorder %s431_s20, 3  ;;  %p117_p5 = scmp.ne.s32.totalorder %s707_s10, %s703_s9 }
  0x11   : > { %p830_p4 = por %p822_p1, %p58_p0  ;;  %p118_p7 = scmp.eq.s32.totalorder %s432_s21, 3 }
  0x12   : > { %p836_p6 = por %p112_p3, %p111_p2  ;;  %p433_p8 = scmp.ge.s32.totalorder %s743_s19, 1 }
  0x13   : > { %p125_p9 = scmp.lt.s32.totalorder %s743_s19, 5  ;;  %p842_p10 = por %p118_p7, %p117_p5 }
  0x14   : > { %s999_s24 = scalar_select %p836_p6, 1, 0 }
  0x15   : > { %s1000_s25 = scalar_select %p842_p10, 1, 0 }
  0x16   : > { %p846_p11 = pnand %p433_p8, %p125_p9  ;;  %s745_s27 = smov [#allocation5]  }
  0x17   : > { %1001 = sst [smem:[#allocation12_spill]] %s1000_s25  ;;  %s140_s28 = sshll.u32 %s745_s27, 4  ;;  %s141_s28 = int_to_ptr.vmem [resolvable:$true] %s140_s28 }
  0x18   : > { %p456_p12 = pneg %p846_p11  ;;  %s576_s29 = scalar_lea.vmem %s141_s28, 128 }
  0x19   : > { %p577_p2 = scmp.ne.s32.totalorder %s141_s28, %s576_s29  ;;  %p584_p7 = scmp.lt.s32.totalorder %s141_s28, %s141_s28 }
  0x1a   : > { %p457_p13 = pnand %p456_p12, %p822_p1  ;;  %p585_p6 = scmp.lt.s32.totalorder %s576_s29, %s576_s29 }
  0x1c   : > { %p567_p0 = pneg %p457_p13  ;;  %p586_p10 = por %p585_p6, %p584_p7 }
  0x1e   : > { %p579_p3 = pnand %p577_p2, %p567_p0 }
  0x20   : > { %p580_p5 = pneg %p579_p3 }
  0x22   : > { %p587_p8 = pnand %p586_p10, %p580_p5 }
  0x24   : > { %590 = shalt.err (!%p587_p8)
}
  0x25   : > { %s1003_s1 = sld [smem:[#allocation14_spill]]  ;;  %s34_s4 = sadd.s32 1, %s735_s17 }
  0x26   : > { %s38_s5 = sadd.s32 1, %s739_s18  ;;  %p36_p6 = scmp.ge.s32.totalorder %s34_s4, 2 }
  0x27   : > { %s45_s6 = sadd.s32 1, %s723_s14  ;;  %p52_p9 = scmp.ne.s32.totalorder %s723_s14, %s719_s13 }
  0x28   : > { %p53_p10 = scmp.eq.s32.totalorder %s743_s19, 0  ;;  %s1024_s4 = smov (%p36_p6, %s34_s4), 0 }
  0x29   : > { %1004 = sst [smem:[#allocation13_spill]] %s1024_s4  ;;  %s1026_s5 = smov (!%p36_p6, %s38_s5), %s739_s18 }
  0x2a   : > { %s42_s7 = ssub.s32 %s735_s17, %s1024_s4  ;;  %p868_p12 = por %p53_p10, %p52_p9 }
  0x2b   : > { %459 = dma.hbm_to_vmem [thread:$0]  (!%p457_p13), %s1003_s1, 128, %s141_s28, [#allocation6]  }
  0x2c   : > { %p40_p13 = scmp.ge.s32.totalorder %s1026_s5, 2  ;;  %p43_p0 = scmp.eq.s32.totalorder %s42_s7, 0 }
  0x2d   : > { %s101_s12 = sadd.s32 1, %s711_s11  ;;  %p469_p2 = scmp.lt.s32.totalorder %s743_s19, 4 }
  0x2e   : > { %s1028_s5 = smov (%p40_p13, %s1026_s5), 0  ;;  %s151_s27 = sand.u32 1, %s723_s14  }
  0x2f   : > { %s877_s20 = scalar_select %p43_p0, %s723_s14, %s45_s6  }
  0x30   : > { %s94_s21 = ssub.s32 %s739_s18, %s1028_s5  ;;  %s436_s29 = sshll.u32 %s151_s27, 3 }
  0x31   : > { %s96_s28 = sor.u32 %s94_s21, %s42_s7  ;;  %s437_s30 = sshll.u32 %s735_s17, 7 }
  0x32   : > { %p99_p3 = scmp.eq.s32.totalorder %s96_s28, 0  ;;  %s160_s25 = scalar_lea.hbm %s986_s0, %s437_s30 }
  0x33   : > { %s155_s9 = scalar_lea.vmem [#allocation2], %s436_s29  ;;  %p893_p5 = pnand %p469_p2, %p868_p12 }
  0x34   : > { %s884_s3 = scalar_select %p99_p3, %s711_s11, %s101_s12  }
  0x35   : > { %s162_s2 = sshll.u32 %s155_s9, 4  ;;  %s152_s7 = scalar_lea.sflag [#allocation3], %s151_s27  ;;  %s163_s2 = int_to_ptr.vmem [resolvable:$true] %s162_s2 }
  0x36   : > { %p593_p7 = pneg %p893_p5  ;;  %s604_s21 = scalar_lea.vmem %s163_s2, 128 }
  0x37   : > { %p605_p8 = scmp.ne.s32.totalorder %s163_s2, %s604_s21  ;;  %s746_s12 = smov [#allocation2]  }
  0x38   : > { %s609_s1 = sshll.u32 %s746_s12, 4  ;;  %s610_s1 = int_to_ptr.vmem [resolvable:$false] %s609_s1 }
  0x39   : > { %p607_p6 = pnand %p605_p8, %p593_p7  ;;  %s611_s4 = scalar_lea.vmem %s610_s1, 256 }
  0x3a   : > { %p612_p10 = scmp.lt.s32.totalorder %s163_s2, %s610_s1  ;;  %p613_p13 = scmp.lt.s32.totalorder %s611_s4, %s604_s21 }
  0x3b   : > { %p608_p9 = pneg %p607_p6 }
  0x3c   : > { %p614_p0 = por %p613_p13, %p612_p10 }
  0x3e   : > { %p615_p3 = pnand %p614_p0, %p608_p9 }
  0x40   : > { %618 = shalt.err (!%p615_p3)
}
  0x41   : > { %463 = dma.hbm_to_vmem [thread:$0]  (!%p893_p5), %s160_s25, 128, %s163_s2, %s152_s7  }
  0x42   : > { %171 = sbr.rel (%p846_p11) target bundleno = 108 (0x6c), region = 28  ;;  %s173_s9 = sand.u32 (!%p846_p11), 1, %s719_s13  }
  0x43   : > { %s439_s8 = sshll.u32 (!%p846_p11), %s173_s9, 3  ;;  %s174_s27 = scalar_lea.sflag (!%p846_p11), [#allocation3], %s173_s9 }
  0x44   : > { %s177_s28 = scalar_lea.vmem (!%p846_p11), [#allocation2], %s439_s8 }
  0x47   : > { %690 = dma.done.wait (%p830_p4), %s174_s27, 128  }
  0x48   : > { %692 = vsyncadd (%p830_p4), %s174_s27, 4294967168 }
  0x49   : > { %694 = dma.done.wait (%p822_p1), [#allocation6], 128  }
  0x4a   : > { %696 = vsyncadd (%p822_p1), [#allocation6], 4294967168  ;;  %v209_v0 = vlaneseq  ;;  %v747_v1 = vmov 1966171168   ;;  %s199_s2 = sand.u32 1, %s707_s10   ;;  %v203_v6 = vld [vmem:[%s177_s28] sm:$0xff] }
  0x4b   : > { %v207_v2 = vunpack.c.l.s4 %v747_v1  ;;  %v205_v9 = vcombine.high %v203_v6, %v203_v6  ;;  %s441_s23 = sshll.u32 %s199_s2, 6  ;;  %v254_v13 = vld [vmem:[#allocation5] sm:$0xff]  ;;  %s443_s22 = sshll.u32 %s727_s15, 3 }
  0x4c   : > { %v210_v3 = vshrl.u32 %v209_v0, 7  ;;  %s444_s25 = sshll.u32 %s731_s16, 4  ;;  %s201_s29 = scalar_lea.vmem [#allocation7], %s441_s23 }
  0x4d   : > { %v208_v4 = vunpack.c.0.s8 %v207_v2  ;;  %s325_s26 = sadd.s32 %s444_s25, %s443_s22  ;;  %s328_s15 = sshll.u32 %s201_s29, 4  ;;  %s917_s15 = int_to_ptr.vmem [resolvable:$true] %s328_s15 }
  0x4e   : > { %v257_v8 = vsub.s32 0, %v210_v3  ;;  %s445_s16 = sshll.u32 %s325_s26, 7  ;;  %s1007_s7 = sld [smem:[#allocation15_spill]] }
  0x4f   : > { %v211_v5 = vsub.s32 %v208_v4, %v210_v3  ;;  %s926_s12 = scalar_lea.sflag [#allocation4], %s199_s2  ;;  %s619_s1 = scalar_lea.vmem %s917_s15, 1024 }
  0x50   : > { %p620_p1 = scmp.ne.s32.totalorder %s917_s15, %s619_s1  ;;  %p1008_p4 = scmp.ne.s32.totalorder %s999_s24, 0 }
  0x51   : > { %v212_v7 = vrot.slane %v203_v6, %v211_v5  ;;  %v219_v12 = vrot.slane %v205_v9, %v211_v5  ;;  %s748_s4 = smov [#allocation7]  }
  0x52   : > { %p621_p11 = pnand %p620_p1, %p1008_p4  ;;  %s623_s9 = sshll.u32 %s748_s4, 4  ;;  %s624_s9 = int_to_ptr.vmem [resolvable:$false] %s623_s9 }
  0x53   : > { %v228_v10 = vrot.slane %v212_v7, %v211_v5  ;;  %v220_v11 = vcombine.high %v212_v7, %v212_v7  ;;  %v235_v17 = vrot.slane %v219_v12, %v211_v5  ;;  %v221_v18 = vcombine.high %v219_v12, %v219_v12  ;;  %s625_s8 = scalar_lea.vmem %s624_s9, 2048  ;;  %p626_p2 = scmp.lt.s32.totalorder %s917_s15, %s624_s9 }
  0x54   : > { %s922_s21 = scalar_lea.hbm %s1007_s7, %s445_s16  ;;  %p622_p12 = pneg %p621_p11 }
  0x55   : > { %v258_v14 = vrot.slane %v228_v10, %v257_v8  ;;  %v242_v15 = vrot.slane %v220_v11, %v211_v5  ;;  %v250_v16 = vcombine.high %v228_v10, %v228_v10  ;;  %v274_v23 = vrot.slane %v235_v17, %v257_v8  ;;  %p627_p5 = scmp.lt.s32.totalorder %s625_s8, %s619_s1 }
  0x56   : > { %v249_v24 = vrot.slane %v221_v18, %v211_v5  ;;  %v251_v25 = vcombine.high %v235_v17, %v235_v17 }
  0x57   : > { %v295_v19 = vadd.f32 %v258_v14, %v254_v13  ;;  %v262_v20 = vrot.slane %v242_v15, %v257_v8  ;;  %v266_v21 = vrot.slane %v250_v16, %v257_v8  ;;  %v252_v22 = vcombine.high %v242_v15, %v242_v15  ;;  %p628_p7 = por %p627_p5, %p626_p2 }
  0x58   : > { %v299_v29 = vadd.f32 %v274_v23, %v254_v13  ;;  %v278_v30 = vrot.slane %v249_v24, %v257_v8  ;;  %v282_v31 = vrot.slane %v251_v25, %v257_v8  ;;  %v253_v32 = vcombine.high %v249_v24, %v249_v24 }
  0x59   : > { %303 = vst [vmem:[%s201_s29] sm:$0xff] %v295_v19  ;;  %v296_v26 = vadd.f32 %v262_v20, %v254_v13  ;;  %v297_v27 = vadd.f32 %v266_v21, %v254_v13  ;;  %v270_v28 = vrot.slane %v252_v22, %v257_v8  ;;  %p629_p8 = pnand %p628_p7, %p622_p12 }
  0x5a   : > { %307 = vst [vmem:[%s201_s29 + $0x20] sm:$0xff] %v299_v29  ;;  %v300_v34 = vadd.f32 %v278_v30, %v254_v13  ;;  %v301_v35 = vadd.f32 %v282_v31, %v254_v13  ;;  %v286_v36 = vrot.slane %v253_v32, %v257_v8 }
  0x5b   : > { %304 = vst [vmem:[%s201_s29 + $0x8] sm:$0xff] %v296_v26  ;;  %305 = vst [vmem:[%s201_s29 + $0x10] sm:$0xff] %v297_v27  ;;  %v298_v33 = vadd.f32 %v270_v28, %v254_v13 }
  0x5c   : > { %308 = vst [vmem:[%s201_s29 + $0x28] sm:$0xff] %v300_v34  ;;  %309 = vst [vmem:[%s201_s29 + $0x30] sm:$0xff] %v301_v35  ;;  %v302_v37 = vadd.f32 %v286_v36, %v254_v13 }
  0x5d   : > { %306 = vst [vmem:[%s201_s29 + $0x18] sm:$0xff] %v298_v33 }
  0x5e   : > { %310 = vst [vmem:[%s201_s29 + $0x38] sm:$0xff] %v302_v37 }
  0x5f   : > { %632 = shalt.err (!%p629_p8)
}
  0x60   : > { %s633_s27 = scalar_lea.hbm %s922_s21, 1024  ;;  %s637_s23 = scalar_lea.hbm %s1007_s7, 4096 }
  0x61   : > { %p634_p6 = scmp.ne.s32.totalorder %s922_s21, %s633_s27  ;;  %p638_p13 = scmp.lt.s32.totalorder %s922_s21, %s1007_s7 }
  0x62   : > { %p639_p0 = scmp.lt.s32.totalorder %s637_s23, %s633_s27 }
  0x63   : > { %p635_p9 = pnand %p634_p6, %p1008_p4 }
  0x64   : > { %p640_p3 = por %p639_p0, %p638_p13 }
  0x65   : > { %p636_p10 = pneg %p635_p9 }
  0x67   : > { %p641_p1 = pnand %p640_p3, %p636_p10 }
  0x69   : > { %644 = shalt.err (!%p641_p1)
}
  0x6a   : > { %s749_s26 = smov 128   ;;  %s750_s29 = smov 8  }
  0x6b   : > { %454 = dma.vmem_to_hbm [thread:$0]  (%p1008_p4), %s917_s15, 1024, %s922_s21, %s926_s12, %s749_s26, %s749_s26, %s750_s29  }
  0x6c PF: > { %s1009_s16 = sld [smem:[#allocation11_spill]]  ;;  %p471_p11 = scmp.ge.s32.totalorder %s743_s19, 2 }
  0x6d   : > { %s1010_s30 = sld [smem:[#allocation12_spill]] }
  0x72   : > { %s343_s6 = sand.u32 1, %s1009_s16  }
  0x73   : > { %p1011_p12 = scmp.ne.s32.totalorder %s1010_s30, 0  ;;  %s344_s1 = scalar_lea.sflag [#allocation4], %s343_s6 }
  0x75   : > { %p465_p2 = pnand %p471_p11, %p1011_p12 }
  0x77   : > { %p466_p5 = pneg %p465_p2 }
  0x79   : > { %698 = dma.done.wait (%p466_p5), %s344_s1, 1024  }
  0x7a   : > { %700 = vsyncadd (%p466_p5), %s344_s1, 4294966272  ;;  %s19_s19 = sadd.s32 1, %s743_s19   ;;  %s1012_s24 = sld [smem:[#allocation13_spill]] }
  0x7b   : > { %p16_p7 = scmp.ge.s32.totalorder %s19_s19, 6   ;;  %s1013_s9 = smov %s707_s10 }
  0x7c   : > { %s1014_s10 = smov %s711_s11  ;;  %s1015_s11 = smov %s884_s3 }
  0x7d   : > { %s1016_s12 = smov %s719_s13  ;;  %s1017_s13 = smov %s723_s14 }
  0x7e   : > { %s1018_s14 = smov %s877_s20  ;;  %s1019_s15 = smov %s735_s17 }
  0x7f   : > { %s1020_s16 = smov %s739_s18  ;;  %s1022_s18 = smov %s1028_s5 }
  0x80   : > { %s1021_s17 = smov %s1012_s24  ;;  %18 = sbr.rel (!%p16_p7) target bundleno = 13 (0xd), region = 78 }
  0x85   :  { %349 = vsyncpa [#allocation3], 1 }
  0x86   :  { %351 = vsyncpa [#allocation3 + $0x1], 1 }
  0x87   :  { %352 = vsyncpa [#allocation6], 1 }
  0x88   :  { %353 = vsyncpa [#allocation4], 1 }
  0x89   :  { %355 = vsyncpa [#allocation4 + $0x1], 1 }

</bundles_post_ra>
